<compile_context>
chip_gen: v7x
topology: tpu7x:2x2x1
jax: 0.10.0
libtpu: 0.0.40
codegen_flags: <defaults>
</compile_context>

<pallas_src>
import jax
import jax.numpy as jnp
from jax.experimental import pallas as pl
from jax.experimental.pallas import tpu as pltpu


_TARGET_SPATIAL_ELEMS = 64 * 1024   # spatial elems / grid step (~1.75 MiB traffic)
_MAX_BATCH_BLOCK = 8                # keep the unrolled per-step code small


def _largest_divisor_leq(n: int, cap: int) -> int:
    cap = max(1, min(n, cap))
    for d in range(cap, 0, -1):
        if n % d == 0:
            return d
    return 1


def _plan_tiling(n: int, s: int):
    """Pick (lane, s_rows, t_rows, n_blk, s_pad) for the 2-D spatial view."""
    # Lane width: largest of 512/256/128 dividing the (possibly padded) extent.
    s_pad = ((s + 127) // 128) * 128          # == s when already lane-aligned
    lane = 128
    for cand in (512, 256):
        if s_pad % cand == 0:
            lane = cand
            break
    s_rows = s_pad // lane

    target_rows = max(1, _TARGET_SPATIAL_ELEMS // lane)
    if s_rows <= target_rows:
        t_rows = s_rows                       # full extent: always a legal block
    else:
        base = max(8, (target_rows // 8) * 8)
        t_rows = base
        # Prefer an exact divisor (no ragged last block) if one is close to the
        # target; otherwise rely on Pallas boundary masking for the last block.
        for cand in range(base, max(8, base // 2) - 1, -8):
            if s_rows % cand == 0:
                t_rows = cand
                break

    # Batch blocking: only useful when one batch element's spatial map is small
    # enough to fit in a single row-block.
    n_blk = 1
    if t_rows == s_rows:
        want = max(1, _TARGET_SPATIAL_ELEMS // max(1, s_rows * lane))
        n_blk = _largest_divisor_leq(n, min(want, _MAX_BATCH_BLOCK))
    return lane, s_rows, t_rows, n_blk, s_pad


def _make_outconv_kernel(c_in: int, c_out: int, n_blk: int):
    def kernel(w_ref, b_ref, x_ref, o_ref):
        # w_ref: SMEM (c_out, c_in) f32, b_ref: SMEM (c_out,) f32  (scalar prefetch)
        # x_ref: VMEM (n_blk, c_in, t_rows, lane)
        # o_ref: VMEM (n_blk, c_out, t_rows, lane)
        for b in range(n_blk):
            # Hoist channel loads + f32 casts out of the output-channel loop.
            xs = [x_ref[b, k].astype(jnp.float32) for k in range(c_in)]
            for c in range(c_out):
                acc = xs[0] * w_ref[c, 0]
                for k in range(1, c_in):
                    acc = acc + xs[k] * w_ref[c, k]
                acc = acc + b_ref[c]
                o_ref[b, c] = jax.nn.sigmoid(acc).astype(o_ref.dtype)
    return kernel


def outconv_forward(x_nchw, weight, bias):
    """1x1 conv + sigmoid, NCHW in / NCHW out.

    x_nchw : (N, C_in, H, W)
    weight : (C_out, C_in, 1, 1)   (PyTorch Conv2d layout)
    bias   : (C_out,)
    """
    N, C_in, H, W = x_nchw.shape
    C_out = weight.shape[0]
    S = H * W

    lane, s_rows, t_rows, n_blk, s_pad = _plan_tiling(N, S)

    x3 = x_nchw.reshape(N, C_in, S)           # contiguous view, free
    if s_pad != S:
        # Fallback for spatial extents that are not a multiple of 128: pad the
        # tail only up to the lane width (full-tensor copy; rare path).
        x3 = jnp.pad(x3, ((0, 0), (0, 0), (0, s_pad - S)))
    x4 = x3.reshape(N, C_in, s_rows, lane)    # free reshape of a contiguous view

    w_mat = weight.reshape(C_out, C_in).astype(jnp.float32)   # tiny, SMEM
    b_vec = bias.reshape(C_out).astype(jnp.float32)           # tiny, SMEM

    grid = (N // n_blk, pl.cdiv(s_rows, t_rows))

    out4 = pl.pallas_call(
        _make_outconv_kernel(C_in, C_out, n_blk),
        out_shape=jax.ShapeDtypeStruct((N, C_out, s_rows, lane), x_nchw.dtype),
        grid_spec=pltpu.PrefetchScalarGridSpec(
            num_scalar_prefetch=2,            # weight + bias staged to SMEM once
            grid=grid,
            in_specs=[
                pl.BlockSpec((n_blk, C_in, t_rows, lane),
                             lambda n, r, w_s, b_s: (n, 0, r, 0)),
            ],
            out_specs=pl.BlockSpec((n_blk, C_out, t_rows, lane),
                                   lambda n, r, w_s, b_s: (n, 0, r, 0)),
        ),
        compiler_params=pltpu.CompilerParams(
            dimension_semantics=("parallel", "parallel"),
        ),
    )(w_mat, b_vec, x4)

    out3 = out4.reshape(N, C_out, s_pad)
    if s_pad != S:
        out3 = out3[:, :, :S]
    return out3.reshape(N, C_out, H, W)


if __name__ == "__main__":
    # Deterministic parameter init (synthetic; mirrors nn.Conv2d shapes).
    in_channels, out_channels = 4, 3
    N, H, W = 2, 16, 16

    key = jax.random.PRNGKey(0)
    kx, kw, kb = jax.random.split(key, 3)

    x = jax.random.normal(kx, (N, in_channels, H, W), dtype=jnp.float32)
    # PyTorch Conv2d default init bound = 1/sqrt(fan_in); fan_in = C_in*1*1.
    bound = 1.0 / float(in_channels) ** 0.5
    weight = jax.random.uniform(
        kw, (out_channels, in_channels, 1, 1), jnp.float32, -bound, bound
    )
    bias = jax.random.uniform(kb, (out_channels,), jnp.float32, -bound, bound)

    outconv = jax.jit(outconv_forward)
    out = outconv(x, weight, bias)
    jax.block_until_ready(out)

    # Sanity check against a plain-JAX reference.
    ref = jax.nn.sigmoid(
        jnp.einsum("nchw,oc->nohw", x, weight.reshape(out_channels, in_channels))
        + bias[None, :, None, None]
    )
    assert out.shape == (N, out_channels, H, W)
    assert jnp.allclose(out, ref, atol=1e-5, rtol=1e-5)

    print("KERNEL_OK")
</pallas_src>

<mosaic_0001>
module attributes {stable_mosaic.version = 11 : i64} {
  func.func @kernel(%arg0: i32, %arg1: i32, %arg2: memref<3x4xf32, #tpu.memory_space<smem>>, %arg3: memref<3xf32, #tpu.memory_space<smem>>, %arg4: memref<2x4x1x256xf32, #tpu.memory_space<vmem>>, %arg5: memref<2x3x1x256xf32, #tpu.memory_space<vmem>>) attributes {dimension_semantics = [#tpu.dimension_semantics<parallel>, #tpu.dimension_semantics<parallel>], iteration_bounds = array<i64: 1, 1>, scalar_prefetch = 2 : i64, scratch_operands = 0 : i64, tpu.core_type = #tpu.core_type<tc>, window_params = [{transform_indices = @transform_0, window_bounds = array<i64: 2, 4, 1, 256>}, {transform_indices = @transform_1, window_bounds = array<i64: 2, 3, 1, 256>}]} {
    %c0 = arith.constant 0 : index
    %c0_0 = arith.constant 0 : index
    %c0_1 = arith.constant 0 : index
    %c0_2 = arith.constant 0 : index
    %0 = vector.load %arg4[%c0, %c0_0, %c0_1, %c0_2] : memref<2x4x1x256xf32, #tpu.memory_space<vmem>>, vector<1x1x1x256xf32>
    %1 = vector.shape_cast %0 : vector<1x1x1x256xf32> to vector<1x256xf32>
    %c0_3 = arith.constant 0 : index
    %c1 = arith.constant 1 : index
    %c0_4 = arith.constant 0 : index
    %c0_5 = arith.constant 0 : index
    %2 = vector.load %arg4[%c0_3, %c1, %c0_4, %c0_5] : memref<2x4x1x256xf32, #tpu.memory_space<vmem>>, vector<1x1x1x256xf32>
    %3 = vector.shape_cast %2 : vector<1x1x1x256xf32> to vector<1x256xf32>
    %c0_6 = arith.constant 0 : index
    %c2 = arith.constant 2 : index
    %c0_7 = arith.constant 0 : index
    %c0_8 = arith.constant 0 : index
    %4 = vector.load %arg4[%c0_6, %c2, %c0_7, %c0_8] : memref<2x4x1x256xf32, #tpu.memory_space<vmem>>, vector<1x1x1x256xf32>
    %5 = vector.shape_cast %4 : vector<1x1x1x256xf32> to vector<1x256xf32>
    %c0_9 = arith.constant 0 : index
    %c3 = arith.constant 3 : index
    %c0_10 = arith.constant 0 : index
    %c0_11 = arith.constant 0 : index
    %6 = vector.load %arg4[%c0_9, %c3, %c0_10, %c0_11] : memref<2x4x1x256xf32, #tpu.memory_space<vmem>>, vector<1x1x1x256xf32>
    %7 = vector.shape_cast %6 : vector<1x1x1x256xf32> to vector<1x256xf32>
    %c0_12 = arith.constant 0 : index
    %c0_13 = arith.constant 0 : index
    %8 = memref.load %arg2[%c0_12, %c0_13] : memref<3x4xf32, #tpu.memory_space<smem>>
    %9 = vector.broadcast %8 : f32 to vector<1x256xf32>
    %10 = arith.mulf %1, %9 : vector<1x256xf32>
    %c0_14 = arith.constant 0 : index
    %c1_15 = arith.constant 1 : index
    %11 = memref.load %arg2[%c0_14, %c1_15] : memref<3x4xf32, #tpu.memory_space<smem>>
    %12 = vector.broadcast %11 : f32 to vector<1x256xf32>
    %13 = arith.mulf %3, %12 : vector<1x256xf32>
    %14 = arith.addf %10, %13 : vector<1x256xf32>
    %c0_16 = arith.constant 0 : index
    %c2_17 = arith.constant 2 : index
    %15 = memref.load %arg2[%c0_16, %c2_17] : memref<3x4xf32, #tpu.memory_space<smem>>
    %16 = vector.broadcast %15 : f32 to vector<1x256xf32>
    %17 = arith.mulf %5, %16 : vector<1x256xf32>
    %18 = arith.addf %14, %17 : vector<1x256xf32>
    %c0_18 = arith.constant 0 : index
    %c3_19 = arith.constant 3 : index
    %19 = memref.load %arg2[%c0_18, %c3_19] : memref<3x4xf32, #tpu.memory_space<smem>>
    %20 = vector.broadcast %19 : f32 to vector<1x256xf32>
    %21 = arith.mulf %7, %20 : vector<1x256xf32>
    %22 = arith.addf %18, %21 : vector<1x256xf32>
    %c0_20 = arith.constant 0 : index
    %23 = memref.load %arg3[%c0_20] : memref<3xf32, #tpu.memory_space<smem>>
    %24 = vector.broadcast %23 : f32 to vector<1x256xf32>
    %25 = arith.addf %22, %24 : vector<1x256xf32>
    %26 = arith.negf %25 : vector<1x256xf32>
    %27 = math.exp %26 : vector<1x256xf32>
    %cst = arith.constant 1.000000e+00 : f32
    %28 = vector.broadcast %cst : f32 to vector<1x256xf32>
    %29 = arith.addf %28, %27 : vector<1x256xf32>
    %30 = arith.divf %28, %29 : vector<1x256xf32>
    %c0_21 = arith.constant 0 : index
    %c0_22 = arith.constant 0 : index
    %c0_23 = arith.constant 0 : index
    %c0_24 = arith.constant 0 : index
    %31 = vector.load %arg5[%c0_21, %c0_22, %c0_23, %c0_24] : memref<2x3x1x256xf32, #tpu.memory_space<vmem>>, vector<1x1x1x256xf32>
    %32 = vector.shape_cast %31 : vector<1x1x1x256xf32> to vector<1x256xf32>
    %33 = vector.shape_cast %30 : vector<1x256xf32> to vector<1x1x1x256xf32>
    tpu.vector_store %arg5[%c0_21, %c0_22, %c0_23, %c0_24], %33 {strides = array<i32>} : memref<2x3x1x256xf32, #tpu.memory_space<vmem>>, vector<1x1x1x256xf32>,
    %c1_25 = arith.constant 1 : index
    %c0_26 = arith.constant 0 : index
    %34 = memref.load %arg2[%c1_25, %c0_26] : memref<3x4xf32, #tpu.memory_space<smem>>
    %35 = vector.broadcast %34 : f32 to vector<1x256xf32>
    %36 = arith.mulf %1, %35 : vector<1x256xf32>
    %c1_27 = arith.constant 1 : index
    %c1_28 = arith.constant 1 : index
    %37 = memref.load %arg2[%c1_27, %c1_28] : memref<3x4xf32, #tpu.memory_space<smem>>
    %38 = vector.broadcast %37 : f32 to vector<1x256xf32>
    %39 = arith.mulf %3, %38 : vector<1x256xf32>
    %40 = arith.addf %36, %39 : vector<1x256xf32>
    %c1_29 = arith.constant 1 : index
    %c2_30 = arith.constant 2 : index
    %41 = memref.load %arg2[%c1_29, %c2_30] : memref<3x4xf32, #tpu.memory_space<smem>>
    %42 = vector.broadcast %41 : f32 to vector<1x256xf32>
    %43 = arith.mulf %5, %42 : vector<1x256xf32>
    %44 = arith.addf %40, %43 : vector<1x256xf32>
    %c1_31 = arith.constant 1 : index
    %c3_32 = arith.constant 3 : index
    %45 = memref.load %arg2[%c1_31, %c3_32] : memref<3x4xf32, #tpu.memory_space<smem>>
    %46 = vector.broadcast %45 : f32 to vector<1x256xf32>
    %47 = arith.mulf %7, %46 : vector<1x256xf32>
    %48 = arith.addf %44, %47 : vector<1x256xf32>
    %c1_33 = arith.constant 1 : index
    %49 = memref.load %arg3[%c1_33] : memref<3xf32, #tpu.memory_space<smem>>
    %50 = vector.broadcast %49 : f32 to vector<1x256xf32>
    %51 = arith.addf %48, %50 : vector<1x256xf32>
    %52 = arith.negf %51 : vector<1x256xf32>
    %53 = math.exp %52 : vector<1x256xf32>
    %cst_34 = arith.constant 1.000000e+00 : f32
    %54 = vector.broadcast %cst_34 : f32 to vector<1x256xf32>
    %55 = arith.addf %54, %53 : vector<1x256xf32>
    %56 = arith.divf %54, %55 : vector<1x256xf32>
    %c0_35 = arith.constant 0 : index
    %c1_36 = arith.constant 1 : index
    %c0_37 = arith.constant 0 : index
    %c0_38 = arith.constant 0 : index
    %57 = vector.load %arg5[%c0_35, %c1_36, %c0_37, %c0_38] : memref<2x3x1x256xf32, #tpu.memory_space<vmem>>, vector<1x1x1x256xf32>
    %58 = vector.shape_cast %57 : vector<1x1x1x256xf32> to vector<1x256xf32>
    %59 = vector.shape_cast %56 : vector<1x256xf32> to vector<1x1x1x256xf32>
    tpu.vector_store %arg5[%c0_35, %c1_36, %c0_37, %c0_38], %59 {strides = array<i32>} : memref<2x3x1x256xf32, #tpu.memory_space<vmem>>, vector<1x1x1x256xf32>,
    %c2_39 = arith.constant 2 : index
    %c0_40 = arith.constant 0 : index
    %60 = memref.load %arg2[%c2_39, %c0_40] : memref<3x4xf32, #tpu.memory_space<smem>>
    %61 = vector.broadcast %60 : f32 to vector<1x256xf32>
    %62 = arith.mulf %1, %61 : vector<1x256xf32>
    %c2_41 = arith.constant 2 : index
    %c1_42 = arith.constant 1 : index
    %63 = memref.load %arg2[%c2_41, %c1_42] : memref<3x4xf32, #tpu.memory_space<smem>>
    %64 = vector.broadcast %63 : f32 to vector<1x256xf32>
    %65 = arith.mulf %3, %64 : vector<1x256xf32>
    %66 = arith.addf %62, %65 : vector<1x256xf32>
    %c2_43 = arith.constant 2 : index
    %c2_44 = arith.constant 2 : index
    %67 = memref.load %arg2[%c2_43, %c2_44] : memref<3x4xf32, #tpu.memory_space<smem>>
    %68 = vector.broadcast %67 : f32 to vector<1x256xf32>
    %69 = arith.mulf %5, %68 : vector<1x256xf32>
    %70 = arith.addf %66, %69 : vector<1x256xf32>
    %c2_45 = arith.constant 2 : index
    %c3_46 = arith.constant 3 : index
    %71 = memref.load %arg2[%c2_45, %c3_46] : memref<3x4xf32, #tpu.memory_space<smem>>
    %72 = vector.broadcast %71 : f32 to vector<1x256xf32>
    %73 = arith.mulf %7, %72 : vector<1x256xf32>
    %74 = arith.addf %70, %73 : vector<1x256xf32>
    %c2_47 = arith.constant 2 : index
    %75 = memref.load %arg3[%c2_47] : memref<3xf32, #tpu.memory_space<smem>>
    %76 = vector.broadcast %75 : f32 to vector<1x256xf32>
    %77 = arith.addf %74, %76 : vector<1x256xf32>
    %78 = arith.negf %77 : vector<1x256xf32>
    %79 = math.exp %78 : vector<1x256xf32>
    %cst_48 = arith.constant 1.000000e+00 : f32
    %80 = vector.broadcast %cst_48 : f32 to vector<1x256xf32>
    %81 = arith.addf %80, %79 : vector<1x256xf32>
    %82 = arith.divf %80, %81 : vector<1x256xf32>
    %c0_49 = arith.constant 0 : index
    %c2_50 = arith.constant 2 : index
    %c0_51 = arith.constant 0 : index
    %c0_52 = arith.constant 0 : index
    %83 = vector.load %arg5[%c0_49, %c2_50, %c0_51, %c0_52] : memref<2x3x1x256xf32, #tpu.memory_space<vmem>>, vector<1x1x1x256xf32>
    %84 = vector.shape_cast %83 : vector<1x1x1x256xf32> to vector<1x256xf32>
    %85 = vector.shape_cast %82 : vector<1x256xf32> to vector<1x1x1x256xf32>
    tpu.vector_store %arg5[%c0_49, %c2_50, %c0_51, %c0_52], %85 {strides = array<i32>} : memref<2x3x1x256xf32, #tpu.memory_space<vmem>>, vector<1x1x1x256xf32>,
    %c1_53 = arith.constant 1 : index
    %c0_54 = arith.constant 0 : index
    %c0_55 = arith.constant 0 : index
    %c0_56 = arith.constant 0 : index
    %86 = vector.load %arg4[%c1_53, %c0_54, %c0_55, %c0_56] : memref<2x4x1x256xf32, #tpu.memory_space<vmem>>, vector<1x1x1x256xf32>
    %87 = vector.shape_cast %86 : vector<1x1x1x256xf32> to vector<1x256xf32>
    %c1_57 = arith.constant 1 : index
    %c1_58 = arith.constant 1 : index
    %c0_59 = arith.constant 0 : index
    %c0_60 = arith.constant 0 : index
    %88 = vector.load %arg4[%c1_57, %c1_58, %c0_59, %c0_60] : memref<2x4x1x256xf32, #tpu.memory_space<vmem>>, vector<1x1x1x256xf32>
    %89 = vector.shape_cast %88 : vector<1x1x1x256xf32> to vector<1x256xf32>
    %c1_61 = arith.constant 1 : index
    %c2_62 = arith.constant 2 : index
    %c0_63 = arith.constant 0 : index
    %c0_64 = arith.constant 0 : index
    %90 = vector.load %arg4[%c1_61, %c2_62, %c0_63, %c0_64] : memref<2x4x1x256xf32, #tpu.memory_space<vmem>>, vector<1x1x1x256xf32>
    %91 = vector.shape_cast %90 : vector<1x1x1x256xf32> to vector<1x256xf32>
    %c1_65 = arith.constant 1 : index
    %c3_66 = arith.constant 3 : index
    %c0_67 = arith.constant 0 : index
    %c0_68 = arith.constant 0 : index
    %92 = vector.load %arg4[%c1_65, %c3_66, %c0_67, %c0_68] : memref<2x4x1x256xf32, #tpu.memory_space<vmem>>, vector<1x1x1x256xf32>
    %93 = vector.shape_cast %92 : vector<1x1x1x256xf32> to vector<1x256xf32>
    %c0_69 = arith.constant 0 : index
    %c0_70 = arith.constant 0 : index
    %94 = memref.load %arg2[%c0_69, %c0_70] : memref<3x4xf32, #tpu.memory_space<smem>>
    %95 = vector.broadcast %94 : f32 to vector<1x256xf32>
    %96 = arith.mulf %87, %95 : vector<1x256xf32>
    %c0_71 = arith.constant 0 : index
    %c1_72 = arith.constant 1 : index
    %97 = memref.load %arg2[%c0_71, %c1_72] : memref<3x4xf32, #tpu.memory_space<smem>>
    %98 = vector.broadcast %97 : f32 to vector<1x256xf32>
    %99 = arith.mulf %89, %98 : vector<1x256xf32>
    %100 = arith.addf %96, %99 : vector<1x256xf32>
    %c0_73 = arith.constant 0 : index
    %c2_74 = arith.constant 2 : index
    %101 = memref.load %arg2[%c0_73, %c2_74] : memref<3x4xf32, #tpu.memory_space<smem>>
    %102 = vector.broadcast %101 : f32 to vector<1x256xf32>
    %103 = arith.mulf %91, %102 : vector<1x256xf32>
    %104 = arith.addf %100, %103 : vector<1x256xf32>
    %c0_75 = arith.constant 0 : index
    %c3_76 = arith.constant 3 : index
    %105 = memref.load %arg2[%c0_75, %c3_76] : memref<3x4xf32, #tpu.memory_space<smem>>
    %106 = vector.broadcast %105 : f32 to vector<1x256xf32>
    %107 = arith.mulf %93, %106 : vector<1x256xf32>
    %108 = arith.addf %104, %107 : vector<1x256xf32>
    %c0_77 = arith.constant 0 : index
    %109 = memref.load %arg3[%c0_77] : memref<3xf32, #tpu.memory_space<smem>>
    %110 = vector.broadcast %109 : f32 to vector<1x256xf32>
    %111 = arith.addf %108, %110 : vector<1x256xf32>
    %112 = arith.negf %111 : vector<1x256xf32>
    %113 = math.exp %112 : vector<1x256xf32>
    %cst_78 = arith.constant 1.000000e+00 : f32
    %114 = vector.broadcast %cst_78 : f32 to vector<1x256xf32>
    %115 = arith.addf %114, %113 : vector<1x256xf32>
    %116 = arith.divf %114, %115 : vector<1x256xf32>
    %c1_79 = arith.constant 1 : index
    %c0_80 = arith.constant 0 : index
    %c0_81 = arith.constant 0 : index
    %c0_82 = arith.constant 0 : index
    %117 = vector.load %arg5[%c1_79, %c0_80, %c0_81, %c0_82] : memref<2x3x1x256xf32, #tpu.memory_space<vmem>>, vector<1x1x1x256xf32>
    %118 = vector.shape_cast %117 : vector<1x1x1x256xf32> to vector<1x256xf32>
    %119 = vector.shape_cast %116 : vector<1x256xf32> to vector<1x1x1x256xf32>
    tpu.vector_store %arg5[%c1_79, %c0_80, %c0_81, %c0_82], %119 {strides = array<i32>} : memref<2x3x1x256xf32, #tpu.memory_space<vmem>>, vector<1x1x1x256xf32>,
    %c1_83 = arith.constant 1 : index
    %c0_84 = arith.constant 0 : index
    %120 = memref.load %arg2[%c1_83, %c0_84] : memref<3x4xf32, #tpu.memory_space<smem>>
    %121 = vector.broadcast %120 : f32 to vector<1x256xf32>
    %122 = arith.mulf %87, %121 : vector<1x256xf32>
    %c1_85 = arith.constant 1 : index
    %c1_86 = arith.constant 1 : index
    %123 = memref.load %arg2[%c1_85, %c1_86] : memref<3x4xf32, #tpu.memory_space<smem>>
    %124 = vector.broadcast %123 : f32 to vector<1x256xf32>
    %125 = arith.mulf %89, %124 : vector<1x256xf32>
    %126 = arith.addf %122, %125 : vector<1x256xf32>
    %c1_87 = arith.constant 1 : index
    %c2_88 = arith.constant 2 : index
    %127 = memref.load %arg2[%c1_87, %c2_88] : memref<3x4xf32, #tpu.memory_space<smem>>
    %128 = vector.broadcast %127 : f32 to vector<1x256xf32>
    %129 = arith.mulf %91, %128 : vector<1x256xf32>
    %130 = arith.addf %126, %129 : vector<1x256xf32>
    %c1_89 = arith.constant 1 : index
    %c3_90 = arith.constant 3 : index
    %131 = memref.load %arg2[%c1_89, %c3_90] : memref<3x4xf32, #tpu.memory_space<smem>>
    %132 = vector.broadcast %131 : f32 to vector<1x256xf32>
    %133 = arith.mulf %93, %132 : vector<1x256xf32>
    %134 = arith.addf %130, %133 : vector<1x256xf32>
    %c1_91 = arith.constant 1 : index
    %135 = memref.load %arg3[%c1_91] : memref<3xf32, #tpu.memory_space<smem>>
    %136 = vector.broadcast %135 : f32 to vector<1x256xf32>
    %137 = arith.addf %134, %136 : vector<1x256xf32>
    %138 = arith.negf %137 : vector<1x256xf32>
    %139 = math.exp %138 : vector<1x256xf32>
    %cst_92 = arith.constant 1.000000e+00 : f32
    %140 = vector.broadcast %cst_92 : f32 to vector<1x256xf32>
    %141 = arith.addf %140, %139 : vector<1x256xf32>
    %142 = arith.divf %140, %141 : vector<1x256xf32>
    %c1_93 = arith.constant 1 : index
    %c1_94 = arith.constant 1 : index
    %c0_95 = arith.constant 0 : index
    %c0_96 = arith.constant 0 : index
    %143 = vector.load %arg5[%c1_93, %c1_94, %c0_95, %c0_96] : memref<2x3x1x256xf32, #tpu.memory_space<vmem>>, vector<1x1x1x256xf32>
    %144 = vector.shape_cast %143 : vector<1x1x1x256xf32> to vector<1x256xf32>
    %145 = vector.shape_cast %142 : vector<1x256xf32> to vector<1x1x1x256xf32>
    tpu.vector_store %arg5[%c1_93, %c1_94, %c0_95, %c0_96], %145 {strides = array<i32>} : memref<2x3x1x256xf32, #tpu.memory_space<vmem>>, vector<1x1x1x256xf32>,
    %c2_97 = arith.constant 2 : index
    %c0_98 = arith.constant 0 : index
    %146 = memref.load %arg2[%c2_97, %c0_98] : memref<3x4xf32, #tpu.memory_space<smem>>
    %147 = vector.broadcast %146 : f32 to vector<1x256xf32>
    %148 = arith.mulf %87, %147 : vector<1x256xf32>
    %c2_99 = arith.constant 2 : index
    %c1_100 = arith.constant 1 : index
    %149 = memref.load %arg2[%c2_99, %c1_100] : memref<3x4xf32, #tpu.memory_space<smem>>
    %150 = vector.broadcast %149 : f32 to vector<1x256xf32>
    %151 = arith.mulf %89, %150 : vector<1x256xf32>
    %152 = arith.addf %148, %151 : vector<1x256xf32>
    %c2_101 = arith.constant 2 : index
    %c2_102 = arith.constant 2 : index
    %153 = memref.load %arg2[%c2_101, %c2_102] : memref<3x4xf32, #tpu.memory_space<smem>>
    %154 = vector.broadcast %153 : f32 to vector<1x256xf32>
    %155 = arith.mulf %91, %154 : vector<1x256xf32>
    %156 = arith.addf %152, %155 : vector<1x256xf32>
    %c2_103 = arith.constant 2 : index
    %c3_104 = arith.constant 3 : index
    %157 = memref.load %arg2[%c2_103, %c3_104] : memref<3x4xf32, #tpu.memory_space<smem>>
    %158 = vector.broadcast %157 : f32 to vector<1x256xf32>
    %159 = arith.mulf %93, %158 : vector<1x256xf32>
    %160 = arith.addf %156, %159 : vector<1x256xf32>
    %c2_105 = arith.constant 2 : index
    %161 = memref.load %arg3[%c2_105] : memref<3xf32, #tpu.memory_space<smem>>
    %162 = vector.broadcast %161 : f32 to vector<1x256xf32>
    %163 = arith.addf %160, %162 : vector<1x256xf32>
    %164 = arith.negf %163 : vector<1x256xf32>
    %165 = math.exp %164 : vector<1x256xf32>
    %cst_106 = arith.constant 1.000000e+00 : f32
    %166 = vector.broadcast %cst_106 : f32 to vector<1x256xf32>
    %167 = arith.addf %166, %165 : vector<1x256xf32>
    %168 = arith.divf %166, %167 : vector<1x256xf32>
    %c1_107 = arith.constant 1 : index
    %c2_108 = arith.constant 2 : index
    %c0_109 = arith.constant 0 : index
    %c0_110 = arith.constant 0 : index
    %169 = vector.load %arg5[%c1_107, %c2_108, %c0_109, %c0_110] : memref<2x3x1x256xf32, #tpu.memory_space<vmem>>, vector<1x1x1x256xf32>
    %170 = vector.shape_cast %169 : vector<1x1x1x256xf32> to vector<1x256xf32>
    %171 = vector.shape_cast %168 : vector<1x256xf32> to vector<1x1x1x256xf32>
    tpu.vector_store %arg5[%c1_107, %c2_108, %c0_109, %c0_110], %171 {strides = array<i32>} : memref<2x3x1x256xf32, #tpu.memory_space<vmem>>, vector<1x1x1x256xf32>,
    return
  }
  func.func @transform_0(%arg0: i32, %arg1: i32, %arg2: memref<3x4xf32, #tpu.memory_space<smem>>, %arg3: memref<3xf32, #tpu.memory_space<smem>>) -> (i32, i32, i32, i32) {
    %c0_i32 = arith.constant 0 : i32
    %c0_i32_0 = arith.constant 0 : i32
    %c0_i32_1 = arith.constant 0 : i32
    return %arg0, %c0_i32, %arg1, %c0_i32_0 : i32, i32, i32, i32
  }
  func.func @transform_1(%arg0: i32, %arg1: i32, %arg2: memref<3x4xf32, #tpu.memory_space<smem>>, %arg3: memref<3xf32, #tpu.memory_space<smem>>) -> (i32, i32, i32, i32) {
    %c0_i32 = arith.constant 0 : i32
    %c0_i32_0 = arith.constant 0 : i32
    %c0_i32_1 = arith.constant 0 : i32
    return %arg0, %c0_i32, %arg1, %c0_i32_0 : i32, i32, i32, i32
  }
}

</mosaic_0001>

<bundles_post_ra>
// kernel: outconv_forward.1
= control target key start
LH: loop header
LB: loop body
LE: loop exit
PB: predicated region body
PF: predicated region fallthrough
CT: control target
= control target key end

     0   :  { %s425_s0 = inlined_call_operand.vmem [shape: f32[3,4], index: 0, kind: input, shape index: {}]   ;;  %s426_s2 = inlined_call_operand.vmem [shape: f32[2,4,1,256], index: 2, kind: input, shape index: {}]   ;;  %s427_s3 = inlined_call_operand.vmem [shape: f32[2,3,1,256], index: 3, kind: output, shape index: {}]   ;;  %s428_s1 = inlined_call_operand.vmem [shape: f32[3], index: 1, kind: input, shape index: {}]  }
   0x1   :  { %s8_s14 = sshll.u32 %s425_s0, 4  ;;  %s12_s17 = sshll.u32 %s428_s1, 4  ;;  %s9_s14 = int_to_ptr.vmem [resolvable:$true] %s8_s14  ;;  %s13_s17 = int_to_ptr.vmem [resolvable:$true] %s12_s17 }
   0x2   :  { %s268_s18 = scalar_lea.vmem %s9_s14, 64  ;;  %p273_p1 = scmp.lt.s32.totalorder %s9_s14, %s9_s14 }
   0x3   :  { %p269_p0 = scmp.ne.s32.totalorder %s9_s14, %s268_s18  ;;  %p274_p2 = scmp.lt.s32.totalorder %s268_s18, %s268_s18 }
   0x5   :  { %p275_p3 = por %p274_p2, %p273_p1 }
   0x7   :  { %p276_p4 = pnand %p275_p3, %p269_p0 }
   0x9   :  { %279 = shalt.err (!%p276_p4)  }
   0xa   :  { %s294_s19 = smov [#allocation3]   ;;  %s280_s20 = scalar_lea.vmem %s13_s17, 16 }
   0xb   :  { %11 = dma.vmem_to_smem %s9_s14, 64, %s294_s19, [#allocation2] }
   0xc   :  { %p281_p5 = scmp.ne.s32.totalorder %s13_s17, %s280_s20  ;;  %p285_p6 = scmp.lt.s32.totalorder %s13_s17, %s13_s17 }
   0xd   :  { %p286_p7 = scmp.lt.s32.totalorder %s280_s20, %s280_s20 }
   0xf   :  { %p287_p8 = por %p286_p7, %p285_p6 }
  0x11   :  { %p288_p9 = pnand %p287_p8, %p281_p5 }
  0x13   :  { %291 = shalt.err (!%p288_p9)  }
  0x14   :  { %s295_s0 = smov [#allocation4]  }
  0x15   :  { %15 = dma.vmem_to_smem %s13_s17, 16, %s295_s0, [#allocation2] }
  0x16   :  { %292 = dma.done.wait [#allocation2], 80 }
  0x17   :  { %293 = vsyncadd [#allocation2], 4294967216 }
  0x18   :  { %17 = sfence }
  0x19   :  { %s322_s1 = sld [smem:[#allocation3]]  ;;  %s324_s21 = sld [smem:[#allocation3 + $0x1]]  ;;  %v20_v0 = vld [vmem:[%s426_s2] sm:$0x3]  ;;  %v198_v1 = vld [vmem:[%s426_s2 + $0x2] sm:$0x3] }
  0x1a   :  { %s326_s22 = sld [smem:[#allocation3 + $0x2]]  ;;  %s328_s23 = sld [smem:[#allocation3 + $0x3]]  ;;  %v199_v2 = vld [vmem:[%s426_s2 + $0x4] sm:$0x3]  ;;  %v200_v3 = vld [vmem:[%s426_s2 + $0x6] sm:$0x3] }
  0x1b   :  { %s333_s26 = sld [smem:[#allocation4]]  ;;  %s340_s30 = sld [smem:[#allocation3 + $0x81]]  ;;  %v219_v26 = vld [vmem:[%s426_s2 + $0x8] sm:$0x3]  ;;  %v220_v31 = vld [vmem:[%s426_s2 + $0xa] sm:$0x3] }
  0x1c   :  { %s335_s27 = sld [smem:[#allocation3 + $0x80]]  ;;  %s342_s4 = sld [smem:[#allocation3 + $0x82]]  ;;  %v221_v32 = vld [vmem:[%s426_s2 + $0xc] sm:$0x3]  ;;  %v222_v33 = vld [vmem:[%s426_s2 + $0xe] sm:$0x3] }
  0x1d   :  { %s347_s7 = sld [smem:[#allocation3 + $0x83]]  ;;  %s349_s8 = sld [smem:[#allocation4 + $0x1]] }
  0x1e   :  { %s354_s11 = sld [smem:[#allocation3 + $0x100]]  ;;  %s356_s12 = sld [smem:[#allocation3 + $0x101]] }
  0x1f   :  { %v28_v4 = vstv %s322_s1  ;;  %v31_v5 = vstv %s324_s21  ;;  %s360_s13 = sld [smem:[#allocation3 + $0x102]]  ;;  %s362_s14 = sld [smem:[#allocation3 + $0x103]] }
  0x20   :  { %v29_v6 = vmul.f32 %v28_v4, %v20_v0  ;;  %v32_v7 = vmul.f32 %v198_v1, %v31_v5  ;;  %v35_v8 = vstv %s326_s22  ;;  %v39_v9 = vstv %s328_s23  ;;  %s366_s15 = sld [smem:[#allocation4 + $0x2]] }
  0x21   :  { %v36_v10 = vmul.f32 %v199_v2, %v35_v8  ;;  %v40_v11 = vmul.f32 %v200_v3, %v39_v9  ;;  %v43_v12 = vstv %s333_s26  ;;  %v60_v16 = vstv %s340_s30 }
  0x22   :  { %v57_v13 = vstv %s335_s27  ;;  %v33_v14 = vadd.f32 %v32_v7, %v29_v6  ;;  %v64_v17 = vstv %s342_s4  ;;  %v61_v18 = vmul.f32 %v198_v1, %v60_v16 }
  0x23   :  { %v58_v15 = vmul.f32 %v57_v13, %v20_v0  ;;  %v65_v19 = vmul.f32 %v199_v2, %v64_v17  ;;  %v68_v20 = vstv %s347_s7  ;;  %v72_v21 = vstv %s349_s8 }
  0x24   :  { %v37_v22 = vadd.f32 %v36_v10, %v33_v14  ;;  %v69_v23 = vmul.f32 %v200_v3, %v68_v20  ;;  %v83_v24 = vstv %s354_s11  ;;  %v86_v25 = vstv %s356_s12 }
  0x25   :  { %v62_v27 = vadd.f32 %v61_v18, %v58_v15  ;;  %v84_v28 = vmul.f32 %v83_v24, %v20_v0  ;;  %v87_v29 = vmul.f32 %v198_v1, %v86_v25  ;;  %v90_v30 = vstv %s360_s13 }
  0x26   :  { %v41_v34 = vadd.f32 %v40_v11, %v37_v22  ;;  %v91_v35 = vmul.f32 %v199_v2, %v90_v30  ;;  %v94_v36 = vstv %s362_s14  ;;  %v98_v37 = vstv %s366_s15 }
  0x27   :  { %v66_v38 = vadd.f32 %v65_v19, %v62_v27  ;;  %v88_v39 = vadd.f32 %v87_v29, %v84_v28  ;;  %v95_v40 = vmul.f32 %v200_v3, %v94_v36  ;;  %v118_v41 = vmul.f32 %v219_v26, %v28_v4 }
  0x28   :  { %v44_v42 = vadd.f32 %v43_v12, %v41_v34  ;;  %v121_v43 = vmul.f32 %v220_v31, %v31_v5  ;;  %v125_v44 = vmul.f32 %v221_v32, %v35_v8  ;;  %v129_v45 = vmul.f32 %v222_v33, %v39_v9 }
  0x29   :  { %v70_v46 = vadd.f32 %v69_v23, %v66_v38  ;;  %v92_v47 = vadd.f32 %v91_v35, %v88_v39  ;;  %v144_v48 = vmul.f32 %v219_v26, %v57_v13  ;;  %v147_v49 = vmul.f32 %v220_v31, %v60_v16 }
  0x2a   :  { %v204_v50 = vmul.f32 -1.442695, %v44_v42  ;;  %v122_v51 = vadd.f32 %v121_v43, %v118_v41  ;;  %v151_v52 = vmul.f32 %v221_v32, %v64_v17  ;;  %v155_v53 = vmul.f32 %v222_v33, %v68_v20 }
  0x2b   :  { %v73_v54 = vadd.f32 %v72_v21, %v70_v46  ;;  %v96_v55 = vadd.f32 %v95_v40, %v92_v47  ;;  %v148_v56 = vadd.f32 %v147_v49, %v144_v48  ;;  %v170_v57 = vmul.f32 %v219_v26, %v83_v24 }
  0x2c   :  { %244 = vpow2.f32 %v204_v50  ;;  %v126_v58 = vadd.f32 %v125_v44, %v122_v51  ;;  %v173_v59 = vmul.f32 %v220_v31, %v86_v25  ;;  %v177_v60 = vmul.f32 %v221_v32, %v90_v30 }
  0x2d   :  { %v210_v61 = vmul.f32 -1.442695, %v73_v54  ;;  %v99_v62 = vadd.f32 %v98_v37, %v96_v55  ;;  %v152_v63 = vadd.f32 %v151_v52, %v148_v56  ;;  %v181_v2 = vmul.f32 %v222_v33, %v94_v36 }
  0x2e   :  { %v130_v0 = vadd.f32 %v129_v45, %v126_v58  ;;  %v174_v1 = vadd.f32 %v173_v59, %v170_v57 }
  0x2f   :  { %246 = vpow2.f32 %v210_v61  ;;  %v217_v3 = vmul.f32 -1.442695, %v99_v62  ;;  %v156_v4 = vadd.f32 %v155_v53, %v152_v63 }
  0x30   :  { %v133_v5 = vadd.f32 %v130_v0, %v43_v12  ;;  %v178_v6 = vadd.f32 %v177_v60, %v174_v1  ;;  %v51_v12 = vlaneseq }
  0x31   :  { %248 = vpow2.f32 %v217_v3  ;;  %v159_v7 = vadd.f32 %v156_v4, %v72_v21 }
  0x32   :  { %v226_v8 = vmul.f32 -1.442695, %v133_v5  ;;  %v182_v9 = vadd.f32 %v181_v2, %v178_v6  ;;  %vm391_vm0 = vcmp.lt.s32.totalorder %v51_v12, 256 }
  0x33   :  { %v233_v10 = vmul.f32 -1.442695, %v159_v7 }
  0x34   :  { %250 = vpow2.f32 %v226_v8  ;;  %v185_v11 = vadd.f32 %v182_v9, %v98_v37 }
  0x35   :  { %252 = vpow2.f32 %v233_v10 }
  0x36   :  { %v245_v13 = vpop.eup %244  ;;  %v240_v14 = vmul.f32 -1.442695, %v185_v11 }
  0x37   :  { %v48_v15 = vadd.f32 1.0, %v245_v13 }
  0x38   :  { %254 = vpow2.f32 %v240_v14 }
  0x39   :  { %v247_v16 = vpop.eup %246  ;;  %256 = vrcp.f32 %v48_v15 }
  0x3a   :  { %v77_v17 = vadd.f32 1.0, %v247_v16 }
  0x3b   :  { %v249_v18 = vpop.eup %248 }
  0x3c   :  { %258 = vrcp.f32 %v77_v17  ;;  %v103_v19 = vadd.f32 1.0, %v249_v18 }
  0x3e   :  { %v251_v20 = vpop.eup %250  ;;  %260 = vrcp.f32 %v103_v19 }
  0x3f   :  { %v253_v21 = vpop.eup %252  ;;  %v137_v22 = vadd.f32 1.0, %v251_v20 }
  0x40   :  { %v163_v23 = vadd.f32 1.0, %v253_v21 }
  0x41   :  { %262 = vrcp.f32 %v137_v22 }
  0x42   :  { %v255_v25 = vpop.eup %254  ;;  %264 = vrcp.f32 %v163_v23 }
  0x43   :  { %v257_v26 = vpop.eup %256  ;;  %v189_v27 = vadd.f32 1.0, %v255_v25 }
  0x44   :  { %55 = vst.msk [vmem:[%s427_s3] sm:$0x3] %vm391_vm0, %v257_v26 }
  0x45   :  { %266 = vrcp.f32 %v189_v27 }
  0x46   :  { %v259_v28 = vpop.eup %258 }
  0x47   :  { %211 = vst.msk [vmem:[%s427_s3 + $0x2] sm:$0x3] %vm391_vm0, %v259_v28 }
  0x48   :  { %v261_v29 = vpop.eup %260 }
  0x49   :  { %218 = vst.msk [vmem:[%s427_s3 + $0x4] sm:$0x3] %vm391_vm0, %v261_v29 }
  0x4b   :  { %v263_v30 = vpop.eup %262 }
  0x4c   :  { %v265_v31 = vpop.eup %264  ;;  %227 = vst.msk [vmem:[%s427_s3 + $0x6] sm:$0x3] %vm391_vm0, %v263_v30 }
  0x4d   :  { %234 = vst.msk [vmem:[%s427_s3 + $0x8] sm:$0x3] %vm391_vm0, %v265_v31 }
  0x4f   :  { %v267_v32 = vpop.eup %266 }
  0x50   :  { %241 = vst.msk [vmem:[%s427_s3 + $0xa] sm:$0x3] %vm391_vm0, %v267_v32 }

</bundles_post_ra>
